<compile_context>
chip_gen: v5e
topology: v5e:2x2
jax: 0.10.0
libtpu: 0.0.40
codegen_flags: <defaults>
</compile_context>

<pallas_src>
import jax
import jax.numpy as jnp
from jax.experimental import pallas as pl
from jax.experimental.pallas import tpu as pltpu

HIDDEN = 50              # nn.Linear(features_n, 50) / nn.Linear(50, 50)
_MAX_BATCH_TILE = 256    # multiple of 8; tiny f32 footprint, safe on v5e/v6e/v7x VMEM


# --------------------------------------------------------------------------- #
# Kernel: fc1 -> ReLU -> fc2 -> ReLU -> {softmax(policy head), value head}
# --------------------------------------------------------------------------- #
def a2c_fused_kernel(x_ref, w1_ref, b1_ref, w2_ref, b2_ref,
                     wp_ref, bp_ref, wv_ref, bv_ref,
                     h_ref, p_ref, v_ref):
    x = x_ref[...]

    # h1 = relu(x @ W1 + b1)
    h1 = jnp.dot(x, w1_ref[...], preferred_element_type=jnp.float32)
    h1 = jnp.maximum(h1 + b1_ref[...], 0.0)

    # h2 = relu(h1 @ W2 + b2)   -- this is A2CNet.forward()'s return value
    h2 = jnp.dot(h1, w2_ref[...], preferred_element_type=jnp.float32)
    h2 = jnp.maximum(h2 + b2_ref[...], 0.0)
    h_ref[...] = h2

    # policy head + softmax (exp runs on the EUP slot; essentially free here)
    logits = jnp.dot(h2, wp_ref[...], preferred_element_type=jnp.float32) + bp_ref[...]
    m = jnp.max(logits, axis=-1, keepdims=True)
    e = jnp.exp(logits - m)
    p_ref[...] = e / jnp.sum(e, axis=-1, keepdims=True)

    # value head
    v_ref[...] = jnp.dot(h2, wv_ref[...], preferred_element_type=jnp.float32) + bv_ref[...]


# --------------------------------------------------------------------------- #
# Wrapper
# --------------------------------------------------------------------------- #
@jax.jit
def a2c_apply(x, w1t, b1, w2t, b2, wpt, bp, wvt, bv):
    """Fused A2C forward.

    x: (B, F) float32.
    Weights pre-transposed to (in, out); biases reshaped to (1, out).
    Returns (hidden (B, 50), probs (B, A), value (B, 1)).
    """
    x = x.astype(jnp.float32)
    B, F = x.shape
    H = w1t.shape[1]
    A = wpt.shape[1]

    # Batch tile: full-array block for small B (no alignment constraint when the
    # block equals the array); otherwise stream 256-row tiles over a grid with
    # the weights resident in VMEM.
    tb = B if B <= _MAX_BATCH_TILE else _MAX_BATCH_TILE
    grid = (pl.cdiv(B, tb),)

    hidden, probs, value = pl.pallas_call(
        a2c_fused_kernel,
        grid=grid,
        out_shape=(
            jax.ShapeDtypeStruct((B, H), jnp.float32),
            jax.ShapeDtypeStruct((B, A), jnp.float32),
            jax.ShapeDtypeStruct((B, 1), jnp.float32),
        ),
        in_specs=[
            pl.BlockSpec((tb, F), lambda i: (i, 0)),   # x: streamed over batch
            pl.BlockSpec((F, H), lambda i: (0, 0)),    # W1^T: VMEM-resident
            pl.BlockSpec((1, H), lambda i: (0, 0)),    # b1
            pl.BlockSpec((H, H), lambda i: (0, 0)),    # W2^T
            pl.BlockSpec((1, H), lambda i: (0, 0)),    # b2
            pl.BlockSpec((H, A), lambda i: (0, 0)),    # Wp^T
            pl.BlockSpec((1, A), lambda i: (0, 0)),    # bp
            pl.BlockSpec((H, 1), lambda i: (0, 0)),    # Wv^T
            pl.BlockSpec((1, 1), lambda i: (0, 0)),    # bv
        ],
        out_specs=(
            pl.BlockSpec((tb, H), lambda i: (i, 0)),
            pl.BlockSpec((tb, A), lambda i: (i, 0)),
            pl.BlockSpec((tb, 1), lambda i: (i, 0)),
        ),
        compiler_params=pltpu.CompilerParams(
            dimension_semantics=("parallel",),         # shard batch across TCs (v7x)
        ),
    )(x, w1t, b1, w2t, b2, wpt, bp, wvt, bv)
    return hidden, probs, value


def prepare_params(p):
    """One-time layout prep (hoisted out of the per-call path)."""
    return dict(
        w1t=jnp.asarray(p["w1"].T, jnp.float32),
        b1=jnp.asarray(p["b1"], jnp.float32).reshape(1, -1),
        w2t=jnp.asarray(p["w2"].T, jnp.float32),
        b2=jnp.asarray(p["b2"], jnp.float32).reshape(1, -1),
        wpt=jnp.asarray(p["wp"].T, jnp.float32),
        bp=jnp.asarray(p["bp"], jnp.float32).reshape(1, -1),
        wvt=jnp.asarray(p["wv"].T, jnp.float32),
        bv=jnp.asarray(p["bv"], jnp.float32).reshape(1, -1),
    )


def _args(prep):
    return (prep["w1t"], prep["b1"], prep["w2t"], prep["b2"],
            prep["wpt"], prep["bp"], prep["wvt"], prep["bv"])


# Convenience entry points mirroring the PyTorch module's methods.
def a2c_forward(x, prep):  # A2CNet.forward
    return a2c_apply(x, *_args(prep))[0]


def a2c_probs(x, prep):    # A2CNet.probs
    return a2c_apply(x, *_args(prep))[1]


def a2c_value(x, prep):    # A2CNet.value
    return a2c_apply(x, *_args(prep))[2]


# --------------------------------------------------------------------------- #
# Reference (pure JAX) and init
# --------------------------------------------------------------------------- #
def init_params(key, features_n, actions_n):
    """Deterministic init mirroring nn.Linear default (uniform +/- 1/sqrt(fan_in))."""
    k1, k2, k3, k4, k5, k6, k7, k8 = jax.random.split(key, 8)

    def lin(kw, kb, fan_in, fan_out):
        bound = 1.0 / jnp.sqrt(jnp.float32(fan_in))
        w = jax.random.uniform(kw, (fan_out, fan_in), jnp.float32, -bound, bound)
        b = jax.random.uniform(kb, (fan_out,), jnp.float32, -bound, bound)
        return w, b

    w1, b1 = lin(k1, k2, features_n, HIDDEN)
    w2, b2 = lin(k3, k4, HIDDEN, HIDDEN)
    wp, bp = lin(k5, k6, HIDDEN, actions_n)
    wv, bv = lin(k7, k8, HIDDEN, 1)
    return dict(w1=w1, b1=b1, w2=w2, b2=b2, wp=wp, bp=bp, wv=wv, bv=bv)


def forward_ref(x, p):
    h = jnp.maximum(x @ p["w1"].T + p["b1"], 0.0)
    h = jnp.maximum(h @ p["w2"].T + p["b2"], 0.0)
    return h


def probs_ref(x, p):
    h = forward_ref(x, p)
    return jax.nn.softmax(h @ p["wp"].T + p["bp"], axis=-1)


def value_ref(x, p):
    return forward_ref(x, p) @ p["wv"].T + p["bv"]


# --------------------------------------------------------------------------- #
if __name__ == "__main__":
    features_n = 8
    actions_n = 4
    batch = 2

    key = jax.random.PRNGKey(0)
    kx, kp, kx2 = jax.random.split(key, 3)
    x = jax.random.normal(kx, (batch, features_n), jnp.float32)
    params = init_params(kp, features_n, actions_n)
    prep = prepare_params(params)  # one-time layout prep (outside the hot path)

    # Small-batch path: single full-array block, grid of 1.
    hidden, probs, value = a2c_apply(x, *_args(prep))
    jax.block_until_ready((hidden, probs, value))

    assert hidden.shape == (batch, HIDDEN), hidden.shape
    assert probs.shape == (batch, actions_n), probs.shape
    assert value.shape == (batch, 1), value.shape
    assert jnp.allclose(hidden, forward_ref(x, params), atol=1e-4, rtol=1e-4)
    assert jnp.allclose(probs, probs_ref(x, params), atol=1e-4, rtol=1e-4)
    assert jnp.allclose(value, value_ref(x, params), atol=1e-4, rtol=1e-4)

    # Larger-batch path: exercises the batch grid (resident weights, streamed x/outputs).
    big_b = 512
    xb = jax.random.normal(kx2, (big_b, features_n), jnp.float32)
    hb, pb, vb = a2c_apply(xb, *_args(prep))
    jax.block_until_ready((hb, pb, vb))
    assert jnp.allclose(hb, forward_ref(xb, params), atol=1e-4, rtol=1e-4)
    assert jnp.allclose(pb, probs_ref(xb, params), atol=1e-4, rtol=1e-4)
    assert jnp.allclose(vb, value_ref(xb, params), atol=1e-4, rtol=1e-4)

    # TODO(synk): bf16 operand cast (keep f32 accumulation) is the next lever for
    # very large batches on v6e/v7x; kept f32 here to preserve tight tolerances.
    print("KERNEL_OK")
</pallas_src>

<mosaic_0001>
module attributes {stable_mosaic.version = 11 : i64} {
  func.func @a2c_fused_kernel(%arg0: i32, %arg1: memref<2x8xf32, #tpu.memory_space<vmem>>, %arg2: memref<8x50xf32, #tpu.memory_space<vmem>>, %arg3: memref<1x50xf32, #tpu.memory_space<vmem>>, %arg4: memref<50x50xf32, #tpu.memory_space<vmem>>, %arg5: memref<1x50xf32, #tpu.memory_space<vmem>>, %arg6: memref<50x4xf32, #tpu.memory_space<vmem>>, %arg7: memref<1x4xf32, #tpu.memory_space<vmem>>, %arg8: memref<50x1xf32, #tpu.memory_space<vmem>>, %arg9: memref<1x1xf32, #tpu.memory_space<vmem>>, %arg10: memref<2x50xf32, #tpu.memory_space<vmem>>, %arg11: memref<2x4xf32, #tpu.memory_space<vmem>>, %arg12: memref<2x1xf32, #tpu.memory_space<vmem>>) attributes {dimension_semantics = [#tpu.dimension_semantics<parallel>], iteration_bounds = array<i64: 1>, scalar_prefetch = 0 : i64, scratch_operands = 0 : i64, tpu.core_type = #tpu.core_type<tc>, window_params = [{transform_indices = @transform_0, window_bounds = array<i64: 2, 8>}, {pipeline_mode = #tpu.pipeline_mode<synchronous>, transform_indices = @transform_1, window_bounds = array<i64: 8, 50>}, {pipeline_mode = #tpu.pipeline_mode<synchronous>, transform_indices = @transform_2, window_bounds = array<i64: 1, 50>}, {pipeline_mode = #tpu.pipeline_mode<synchronous>, transform_indices = @transform_3, window_bounds = array<i64: 50, 50>}, {pipeline_mode = #tpu.pipeline_mode<synchronous>, transform_indices = @transform_4, window_bounds = array<i64: 1, 50>}, {pipeline_mode = #tpu.pipeline_mode<synchronous>, transform_indices = @transform_5, window_bounds = array<i64: 50, 4>}, {pipeline_mode = #tpu.pipeline_mode<synchronous>, transform_indices = @transform_6, window_bounds = array<i64: 1, 4>}, {pipeline_mode = #tpu.pipeline_mode<synchronous>, transform_indices = @transform_7, window_bounds = array<i64: 50, 1>}, {pipeline_mode = #tpu.pipeline_mode<synchronous>, transform_indices = @transform_8, window_bounds = array<i64: 1, 1>}, {transform_indices = @transform_9, window_bounds = array<i64: 2, 50>}, {transform_indices = @transform_10, window_bounds = array<i64: 2, 4>}, {transform_indices = @transform_11, window_bounds = array<i64: 2, 1>}]} {
    %c0 = arith.constant 0 : index
    %c0_0 = arith.constant 0 : index
    %0 = vector.load %arg1[%c0, %c0_0] : memref<2x8xf32, #tpu.memory_space<vmem>>, vector<2x8xf32>
    %c0_1 = arith.constant 0 : index
    %c0_2 = arith.constant 0 : index
    %1 = vector.load %arg2[%c0_1, %c0_2] : memref<8x50xf32, #tpu.memory_space<vmem>>, vector<8x50xf32>
    %cst = arith.constant dense<0.000000e+00> : vector<2x50xf32>
    %2 = tpu.matmul %0, %1, %cst {dimension_numbers = #tpu.dot_dimension_numbers<[1], [0], [0], [1], [0, 0, 1, 1], [], []>} : vector<2x8xf32>, vector<8x50xf32>, vector<2x50xf32> -> vector<2x50xf32>
    %c0_3 = arith.constant 0 : index
    %c0_4 = arith.constant 0 : index
    %3 = vector.load %arg3[%c0_3, %c0_4] : memref<1x50xf32, #tpu.memory_space<vmem>>, vector<1x50xf32>
    %4 = vector.broadcast %3 : vector<1x50xf32> to vector<2x50xf32>
    %5 = arith.addf %2, %4 : vector<2x50xf32>
    %cst_5 = arith.constant 0.000000e+00 : f32
    %6 = vector.broadcast %cst_5 : f32 to vector<2x50xf32>
    %7 = arith.maximumf %5, %6 : vector<2x50xf32>
    %c0_6 = arith.constant 0 : index
    %c0_7 = arith.constant 0 : index
    %8 = vector.load %arg4[%c0_6, %c0_7] : memref<50x50xf32, #tpu.memory_space<vmem>>, vector<50x50xf32>
    %cst_8 = arith.constant dense<0.000000e+00> : vector<2x50xf32>
    %9 = tpu.matmul %7, %8, %cst_8 {dimension_numbers = #tpu.dot_dimension_numbers<[1], [0], [0], [1], [0, 0, 1, 1], [], []>} : vector<2x50xf32>, vector<50x50xf32>, vector<2x50xf32> -> vector<2x50xf32>
    %c0_9 = arith.constant 0 : index
    %c0_10 = arith.constant 0 : index
    %10 = vector.load %arg5[%c0_9, %c0_10] : memref<1x50xf32, #tpu.memory_space<vmem>>, vector<1x50xf32>
    %11 = vector.broadcast %10 : vector<1x50xf32> to vector<2x50xf32>
    %12 = arith.addf %9, %11 : vector<2x50xf32>
    %cst_11 = arith.constant 0.000000e+00 : f32
    %13 = vector.broadcast %cst_11 : f32 to vector<2x50xf32>
    %14 = arith.maximumf %12, %13 : vector<2x50xf32>
    %c0_12 = arith.constant 0 : index
    %c0_13 = arith.constant 0 : index
    %15 = vector.load %arg10[%c0_12, %c0_13] : memref<2x50xf32, #tpu.memory_space<vmem>>, vector<2x50xf32>
    tpu.vector_store %arg10[%c0_12, %c0_13], %14 {strides = array<i32>} : memref<2x50xf32, #tpu.memory_space<vmem>>, vector<2x50xf32>,
    %c0_14 = arith.constant 0 : index
    %c0_15 = arith.constant 0 : index
    %16 = vector.load %arg6[%c0_14, %c0_15] : memref<50x4xf32, #tpu.memory_space<vmem>>, vector<50x4xf32>
    %cst_16 = arith.constant dense<0.000000e+00> : vector<2x4xf32>
    %17 = tpu.matmul %14, %16, %cst_16 {dimension_numbers = #tpu.dot_dimension_numbers<[1], [0], [0], [1], [0, 0, 1, 1], [], []>} : vector<2x50xf32>, vector<50x4xf32>, vector<2x4xf32> -> vector<2x4xf32>
    %c0_17 = arith.constant 0 : index
    %c0_18 = arith.constant 0 : index
    %18 = vector.load %arg7[%c0_17, %c0_18] : memref<1x4xf32, #tpu.memory_space<vmem>>, vector<1x4xf32>
    %19 = vector.broadcast %18 : vector<1x4xf32> to vector<2x4xf32>
    %20 = arith.addf %17, %19 : vector<2x4xf32>
    %cst_19 = arith.constant dense<0xFF800000> : vector<2xf32>
    %21 = vector.multi_reduction <maximumf>, %20, %cst_19 [1] : vector<2x4xf32> to vector<2xf32>
    %22 = vector.shape_cast %21 : vector<2xf32> to vector<2x1xf32>
    %23 = vector.broadcast %22 : vector<2x1xf32> to vector<2x4xf32>
    %24 = arith.subf %20, %23 : vector<2x4xf32>
    %25 = math.exp %24 : vector<2x4xf32>
    %cst_20 = arith.constant dense<0.000000e+00> : vector<2xf32>
    %26 = vector.multi_reduction <add>, %25, %cst_20 [1] : vector<2x4xf32> to vector<2xf32>
    %27 = vector.shape_cast %26 : vector<2xf32> to vector<2x1xf32>
    %28 = vector.broadcast %27 : vector<2x1xf32> to vector<2x4xf32>
    %29 = arith.divf %25, %28 : vector<2x4xf32>
    %c0_21 = arith.constant 0 : index
    %c0_22 = arith.constant 0 : index
    %30 = vector.load %arg11[%c0_21, %c0_22] : memref<2x4xf32, #tpu.memory_space<vmem>>, vector<2x4xf32>
    tpu.vector_store %arg11[%c0_21, %c0_22], %29 {strides = array<i32>} : memref<2x4xf32, #tpu.memory_space<vmem>>, vector<2x4xf32>,
    %c0_23 = arith.constant 0 : index
    %c0_24 = arith.constant 0 : index
    %31 = vector.load %arg8[%c0_23, %c0_24] : memref<50x1xf32, #tpu.memory_space<vmem>>, vector<50x1xf32>
    %cst_25 = arith.constant dense<0.000000e+00> : vector<2x1xf32>
    %32 = tpu.matmul %14, %31, %cst_25 {dimension_numbers = #tpu.dot_dimension_numbers<[1], [0], [0], [1], [0, 0, 1, 1], [], []>} : vector<2x50xf32>, vector<50x1xf32>, vector<2x1xf32> -> vector<2x1xf32>
    %c0_26 = arith.constant 0 : index
    %c0_27 = arith.constant 0 : index
    %33 = vector.load %arg9[%c0_26, %c0_27] : memref<1x1xf32, #tpu.memory_space<vmem>>, vector<1x1xf32>
    %34 = vector.broadcast %33 : vector<1x1xf32> to vector<2x1xf32>
    %35 = arith.addf %32, %34 : vector<2x1xf32>
    %c0_28 = arith.constant 0 : index
    %c0_29 = arith.constant 0 : index
    %36 = vector.load %arg12[%c0_28, %c0_29] : memref<2x1xf32, #tpu.memory_space<vmem>>, vector<2x1xf32>
    tpu.vector_store %arg12[%c0_28, %c0_29], %35 {strides = array<i32>} : memref<2x1xf32, #tpu.memory_space<vmem>>, vector<2x1xf32>,
    return
  }
  func.func @transform_0(%arg0: i32) -> (i32, i32) {
    %c0_i32 = arith.constant 0 : i32
    %c0_i32_0 = arith.constant 0 : i32
    return %arg0, %c0_i32 : i32, i32
  }
  func.func @transform_1(%arg0: i32) -> (i32, i32) {
    %c0_i32 = arith.constant 0 : i32
    %c0_i32_0 = arith.constant 0 : i32
    %c0_i32_1 = arith.constant 0 : i32
    return %c0_i32, %c0_i32_0 : i32, i32
  }
  func.func @transform_2(%arg0: i32) -> (i32, i32) {
    %c0_i32 = arith.constant 0 : i32
    %c0_i32_0 = arith.constant 0 : i32
    %c0_i32_1 = arith.constant 0 : i32
    return %c0_i32, %c0_i32_0 : i32, i32
  }
  func.func @transform_3(%arg0: i32) -> (i32, i32) {
    %c0_i32 = arith.constant 0 : i32
    %c0_i32_0 = arith.constant 0 : i32
    %c0_i32_1 = arith.constant 0 : i32
    return %c0_i32, %c0_i32_0 : i32, i32
  }
  func.func @transform_4(%arg0: i32) -> (i32, i32) {
    %c0_i32 = arith.constant 0 : i32
    %c0_i32_0 = arith.constant 0 : i32
    %c0_i32_1 = arith.constant 0 : i32
    return %c0_i32, %c0_i32_0 : i32, i32
  }
  func.func @transform_5(%arg0: i32) -> (i32, i32) {
    %c0_i32 = arith.constant 0 : i32
    %c0_i32_0 = arith.constant 0 : i32
    %c0_i32_1 = arith.constant 0 : i32
    return %c0_i32, %c0_i32_0 : i32, i32
  }
  func.func @transform_6(%arg0: i32) -> (i32, i32) {
    %c0_i32 = arith.constant 0 : i32
    %c0_i32_0 = arith.constant 0 : i32
    %c0_i32_1 = arith.constant 0 : i32
    return %c0_i32, %c0_i32_0 : i32, i32
  }
  func.func @transform_7(%arg0: i32) -> (i32, i32) {
    %c0_i32 = arith.constant 0 : i32
    %c0_i32_0 = arith.constant 0 : i32
    %c0_i32_1 = arith.constant 0 : i32
    return %c0_i32, %c0_i32_0 : i32, i32
  }
  func.func @transform_8(%arg0: i32) -> (i32, i32) {
    %c0_i32 = arith.constant 0 : i32
    %c0_i32_0 = arith.constant 0 : i32
    %c0_i32_1 = arith.constant 0 : i32
    return %c0_i32, %c0_i32_0 : i32, i32
  }
  func.func @transform_9(%arg0: i32) -> (i32, i32) {
    %c0_i32 = arith.constant 0 : i32
    %c0_i32_0 = arith.constant 0 : i32
    return %arg0, %c0_i32 : i32, i32
  }
  func.func @transform_10(%arg0: i32) -> (i32, i32) {
    %c0_i32 = arith.constant 0 : i32
    %c0_i32_0 = arith.constant 0 : i32
    return %arg0, %c0_i32 : i32, i32
  }
  func.func @transform_11(%arg0: i32) -> (i32, i32) {
    %c0_i32 = arith.constant 0 : i32
    %c0_i32_0 = arith.constant 0 : i32
    return %arg0, %c0_i32 : i32, i32
  }
}

</mosaic_0001>

<bundles_post_ra>
// kernel: a2c_apply.1
= control target key start
LH: loop header
LB: loop body
LE: loop exit
PB: predicated region body
PF: predicated region fallthrough
CT: control target
= control target key end

     0   :  { %s477_s0 = inlined_call_operand.vmem [shape: f32[2,8], index: 0, kind: input, shape index: {}]   ;;  %s478_s1 = inlined_call_operand.vmem [shape: f32[8,50], index: 1, kind: input, shape index: {}]   ;;  %s479_s2 = inlined_call_operand.vmem [shape: f32[1,50], index: 2, kind: input, shape index: {}]   ;;  %s480_s3 = inlined_call_operand.vmem [shape: f32[50,50], index: 3, kind: input, shape index: {}]   ;;  %s481_s4 = inlined_call_operand.vmem [shape: f32[1,50], index: 4, kind: input, shape index: {}]   ;;  %s482_s5 = inlined_call_operand.vmem [shape: f32[50,4], index: 5, kind: input, shape index: {}]   ;;  %s483_s6 = inlined_call_operand.vmem [shape: f32[1,4], index: 6, kind: input, shape index: {}]   ;;  %s484_s7 = inlined_call_operand.vmem [shape: f32[50,1], index: 7, kind: input, shape index: {}]   ;;  %s485_s8 = inlined_call_operand.<no memory space> [shape: f32[1,1], index: 8, kind: input, shape index: {}]   ;;  %s486_s9 = inlined_call_operand.hbm [shape: f32[2,50], index: 9, kind: output, shape index: {0}]   ;;  %s487_s10 = inlined_call_operand.hbm [shape: f32[2,4], index: 10, kind: output, shape index: {1}]   ;;  %s488_s11 = inlined_call_operand.vmem [shape: f32[2,1], index: 11, kind: output, shape index: {2}]  }
   0x1   :  { %v17_v0 = vstv %s485_s8 }
   0x2   :  { %18 = vst [vmem:[#allocation2] sm:$0x1] %v17_v0 }
   0x3   :  { %19 = vsyncpa [#allocation4], 0  ;;  %v40_v1 = vld [vmem:[%s478_s1] sm:$0xff]  ;;  %vm45_vm0 = vcmask 64512   ;;  %v76_v3 = vld [vmem:[%s480_s3 + $0x30] sm:$0x3] }
   0x4   :  { %v39_v2 = vld [vmem:[%s477_s0] sm:$0x3]  ;;  %64 = vmatpush.msra.mxu0 %v40_v1  ;;  %vm85_vm1 = vcmask 1041408   ;;  %v75_v4 = vld [vmem:[%s480_s3 + $0x28] sm:$0xff] }
   0x5   :  { %247 = vmatmul.msk.f32.vlgmr.msra.gmra.mxu0 %vm45_vm0, %v39_v2  ;;  %248 = vmatpush.msk.msra.mxu1 %vm85_vm1, %v76_v3  ;;  %v74_v5 = vld [vmem:[%s480_s3 + $0x20] sm:$0xff] }
   0x6   :  { %20 = vsyncpa [#allocation6], 0  ;;  %v73_v6 = vld [vmem:[%s480_s3 + $0x18] sm:$0xff]  ;;  %v72_v7 = vld [vmem:[%s480_s3 + $0x10] sm:$0xff]  ;;  %vm81_vm2 = vcmask 408576   ;;  %vm110_vm3 = vcmask 402432  }
   0x7   :  { %99 = vmatpush.msra.mxu1 %v75_v4  ;;  %v71_v8 = vld [vmem:[%s480_s3 + $0x8] sm:$0xff]  ;;  %v70_v9 = vld [vmem:[%s480_s3] sm:$0xff]  ;;  %v118_v10 = vld [vmem:[%s482_s5 + $0x30] sm:$0x3]  ;;  %vm209_vm4 = vcmask 1024   ;;  %vm149_vm5 = vcmask 25600  }
   0x8   :  { %v181_v11 = vld [vmem:[%s484_s7 + $0x30] sm:$0x3]  ;;  %v117_v12 = vld [vmem:[%s482_s5 + $0x28] sm:$0xff]  ;;  %250 = vmatpush.msk.msra.mxu2 %vm85_vm1, %v118_v10  ;;  %v116_v14 = vld [vmem:[%s482_s5 + $0x20] sm:$0xff]  ;;  %s218_s24 = sshll.u32 %s486_s9, 4  ;;  %s316_s25 = smov [#allocation3]   ;;  %s219_s24 = int_to_ptr.hbm [resolvable:$true] %s218_s24 }
   0x9   :  { %100 = vmatpush.msra.mxu1 %v74_v5  ;;  %252 = vmatpush.msk.msra.mxu3 %vm85_vm1, %v181_v11  ;;  %v180_v13 = vld [vmem:[%s484_s7 + $0x28] sm:$0xff]  ;;  %v179_v15 = vld [vmem:[%s484_s7 + $0x20] sm:$0xff]  ;;  %v115_v16 = vld [vmem:[%s482_s5 + $0x18] sm:$0xff]  ;;  %s216_s26 = sshll.u32 %s316_s25, 4  ;;  %s229_s0 = sshll.u32 %s487_s10, 4  ;;  %s217_s26 = int_to_ptr.vmem [resolvable:$true] %s216_s26  ;;  %s230_s0 = int_to_ptr.hbm [resolvable:$true] %s229_s0 }
   0xa   :  { %139 = vmatpush.msra.mxu2 %v117_v12  ;;  %v178_v17 = vld [vmem:[%s484_s7 + $0x18] sm:$0xff]  ;;  %v256_v18 = vld [vmem:[%s479_s2] ss:$0 sm:$0xff]  ;;  %v114_v22 = vld [vmem:[%s482_s5 + $0x10] sm:$0xff] }
   0xb   :  { %101 = vmatpush.msra.mxu1 %v73_v6  ;;  %199 = vmatpush.msra.mxu3 %v180_v13  ;;  %v177_v23 = vld [vmem:[%s484_s7 + $0x10] sm:$0xff]  ;;  %v113_v24 = vld [vmem:[%s482_s5 + $0x8] sm:$0xff]  ;;  %v112_v26 = vld [vmem:[%s482_s5] sm:$0xff] }
   0xc   :  { %140 = vmatpush.msra.mxu2 %v116_v14  ;;  %v176_v25 = vld [vmem:[%s484_s7 + $0x8] sm:$0xff]  ;;  %v175_v27 = vld [vmem:[%s484_s7] sm:$0xff] }
   0xd   :  { %102 = vmatpush.msra.mxu1 %v72_v7  ;;  %200 = vmatpush.msra.mxu3 %v179_v15  ;;  %v257_v28 = vld [vmem:[%s481_s4] ss:$0 sm:$0xff] }
   0xe   :  { %141 = vmatpush.msra.mxu2 %v115_v16  ;;  %v258_v32 = vld [vmem:[%s483_s6] ss:$0 sm:$0xff] }
   0xf   :  { %103 = vmatpush.msra.mxu1 %v71_v8  ;;  %201 = vmatpush.msra.mxu3 %v178_v17  ;;  %v259_v33 = vld [vmem:[#allocation2] ss:$0 sm:$0xff] }
  0x10   :  { %142 = vmatpush.msra.mxu2 %v114_v22 }
  0x11   :  { %104 = vmatpush.msra.mxu1 %v70_v9  ;;  %202 = vmatpush.msra.mxu3 %v177_v23 }
  0x12   :  { %143 = vmatpush.msra.mxu2 %v113_v24 }
  0x13   :  { %203 = vmatpush.msra.mxu3 %v176_v25 }
  0x14   :  { %144 = vmatpush.msra.mxu2 %v112_v26 }
  0x15   :  { %204 = vmatpush.msra.mxu3 %v175_v27 }
  0x82   :  { %v66_v19 = vpop.f32.mrf.mxu0 }
  0x83   :  { %v67_v20 = vadd.f32 %v256_v18, %v66_v19 }
  0x85   :  { %v69_v21 = vmax.f32 %v67_v20, 0.0 }
  0x87   :  { %249 = vmatmul.msk.f32.vlgmr.msra.gmra.mxu1 %vm81_vm2, %v69_v21 }
 0x104   :  { %v106_v29 = vpop.f32.mrf.mxu1 }
 0x105   :  { %v107_v30 = vadd.f32 %v257_v28, %v106_v29 }
 0x107   :  { %v109_v31 = vmax.f32 %v107_v30, 0.0 }
 0x109   :  { %251 = vmatmul.msk.f32.vlgmr.msra.gmra.mxu2 %vm81_vm2, %v109_v31  ;;  %253 = vmatmul.msk.f32.vlgmr.msra.gmra.mxu3 %vm81_vm2, %v109_v31  ;;  %111 = vst.msk [vmem:[#allocation3] sm:$0x3] %vm110_vm3, %v109_v31 }
 0x10a   :  { %221 = dma.vmem_to_hbm [thread:$0]  %s217_s26, 32, %s219_s24, [#allocation4]  }
 0x18c   :  { %v146_v34 = vpop.f32.mrf.mxu2  ;;  %v206_v35 = vpop.f32.mrf.mxu3 }
 0x18d   :  { %v147_v36 = vadd.f32 %v258_v32, %v146_v34  ;;  %v207_v37 = vadd.f32 %v259_v33, %v206_v35 }
 0x18f   :  { %210 = vst.msk [vmem:[%s488_s11] sm:$0x3] %vm209_vm4, %v207_v37  ;;  %v150_v38 = vsel %vm149_vm5, %v147_v36, -inf  ;;  %s317_s11 = smov [#allocation5]  }
 0x190   :  { %151 = vmax.xlane.f32.xlu0 %v150_v38  ;;  %s227_s9 = sshll.u32 %s317_s11, 4  ;;  %s228_s9 = int_to_ptr.vmem [resolvable:$true] %s227_s9 }
 0x203   :  { %v152_v39 = vpop.xlane.xlu0 %151 }
 0x204   :  { %v153_v40 = vsub.f32 %v147_v36, %v152_v39 }
 0x206   :  { %v154_v41 = vmul.f32 1.442695, %v153_v40 }
 0x208   :  { %260 = vpow2.f32 %v154_v41 }
 0x20e   :  { %v261_v42 = vpop.eup %260 }
 0x20f   :  { %v156_v43 = vsel %vm149_vm5, %v261_v42, 0.0 }
 0x210   :  { %157 = vadd.xlane.f32.xlu0 %v156_v43 }
 0x283   :  { %v158_v44 = vpop.xlane.xlu0 %157 }
 0x284   :  { %262 = vrcp.f32 %v158_v44  ;;  %v170_v48 = vand.u32 2147483648, %v158_v44  ;;  %v168_v50 = vand.u32 2147483647, %v158_v44  ;;  %vm164_vm7 = vweird.f32 %v158_v44 }
 0x286   :  { %v171_v52 = vor.u32 1.1754944e-38, %v170_v48  ;;  %vm169_vm9 = vcmp.eq.f32.partialorder %v168_v50, 8.507059e+37 }
 0x28a   :  { %v263_v45 = vpop.eup %262 }
 0x28b   :  { %v160_v46 = vmul.f32 %v263_v45, %v158_v44  ;;  %vm165_vm6 = vweird.f32 %v263_v45 }
 0x28c   :  { %vm166_vm8 = vmor %vm164_vm7, %vm165_vm6 }
 0x28d   :  { %v161_v47 = vsub.f32 1.0, %v160_v46 }
 0x28f   :  { %v162_v49 = vmul.f32 %v263_v45, %v161_v47 }
 0x291   :  { %v163_v51 = vadd.f32 %v263_v45, %v162_v49 }
 0x293   :  { %v167_v53 = vsel %vm166_vm8, %v263_v45, %v163_v51 }
 0x294   :  { %v172_v54 = vsel %vm169_vm9, %v171_v52, %v167_v53 }
 0x295   :  { %v173_v55 = vmul.f32 %v261_v42, %v172_v54 }
 0x297   :  { %174 = vst.msk [vmem:[#allocation5] sm:$0x3] %vm149_vm5, %v173_v55 }
 0x298   :  { %232 = dma.vmem_to_hbm [thread:$0]  %s228_s9, 32, %s230_s0, [#allocation6]  }
 0x299   :  { %312 = dma.done.wait [#allocation4], 32  }
 0x29a   :  { %313 = vsyncadd [#allocation4], 4294967264 }
 0x29b   :  { %314 = dma.done.wait [#allocation6], 32  }
 0x29c   :  { %315 = vsyncadd [#allocation6], 4294967264 }
 0x29d   :  { %245 = vsyncpa [#allocation4], 1 }
 0x29e   :  { %246 = vsyncpa [#allocation6], 1 }

</bundles_post_ra>
